<compile_context>
chip_gen: v5e
topology: v5e:2x2
jax: 0.10.0
libtpu: 0.0.40
codegen_flags: <defaults>
</compile_context>

<pallas_src>
import functools

import jax
import jax.numpy as jnp
from jax import lax
from jax.experimental import pallas as pl
from jax.experimental.pallas import tpu as pltpu


# -----------------------------------------------------------------------------
# Shared LSTM cell (PyTorch gate order: i, f, g, o).  All operands live in
# VMEM / vregs; weights are read from the direction-stacked VMEM refs.
# -----------------------------------------------------------------------------
def _lstm_cell(x_t, h, c, w_ih, w_hh, b):
    """x_t: (B, D), h/c: (B, H), w_ih: (D, 4H), w_hh: (H, 4H), b: (1, 4H)."""
    hdim = h.shape[-1]
    gates = (jnp.dot(x_t, w_ih, preferred_element_type=jnp.float32)
             + jnp.dot(h, w_hh, preferred_element_type=jnp.float32)
             + b)                                            # (B, 4H)
    # NOTE: with H=32 the gate slices are sub-lane-tile; fine at this size.
    i_g = jax.nn.sigmoid(gates[:, 0 * hdim:1 * hdim])
    f_g = jax.nn.sigmoid(gates[:, 1 * hdim:2 * hdim])
    g_g = jnp.tanh(gates[:, 2 * hdim:3 * hdim])
    o_g = jax.nn.sigmoid(gates[:, 3 * hdim:4 * hdim])
    c_new = f_g * c + i_g * g_g
    h_new = o_g * jnp.tanh(c_new)
    return h_new, c_new


# -----------------------------------------------------------------------------
# Fused bidirectional LSTM layer (layer 0): single grid step, full sequence
# resident in VMEM, in-kernel time loop.  Writes (T, B, 2H) with forward in
# [..., :H] and reverse in [..., H:] (no HBM reverse / concatenate needed).
# TODO(synk): on v7x the independent fwd/rev recurrences could be split across
# the two TensorCores via a size-2 "parallel" grid axis.
# -----------------------------------------------------------------------------
def _bilstm_seq_kernel(x_ref, wih_ref, whh_ref, b_ref, out_ref, hf_sc, hr_sc):
    T, B, _ = x_ref.shape
    H = hf_sc.shape[-1]

    def body(t, carry):
        h_f, c_f, h_r, c_r = carry
        x_f = x_ref[t].astype(jnp.float32)
        x_r = x_ref[T - 1 - t].astype(jnp.float32)
        h_f, c_f = _lstm_cell(x_f, h_f, c_f, wih_ref[0], whh_ref[0], b_ref[0])
        h_r, c_r = _lstm_cell(x_r, h_r, c_r, wih_ref[1], whh_ref[1], b_ref[1])
        hf_sc[t] = h_f
        hr_sc[T - 1 - t] = h_r
        return h_f, c_f, h_r, c_r

    z = jnp.zeros((B, H), jnp.float32)
    lax.fori_loop(0, T, body, (z, z, z, z))

    # One lane-dense (T, B, 2H) store instead of per-step half-width stores.
    out_ref[...] = jnp.concatenate([hf_sc[...], hr_sc[...]],
                                   axis=-1).astype(out_ref.dtype)


def bilstm_seq_pallas(x_tbd, wih, whh, bias):
    """x_tbd: (T, B, D) f32; wih: (2, D, 4H); whh: (2, H, 4H); bias: (2, 1, 4H)."""
    T, B, D = x_tbd.shape
    H4 = wih.shape[-1]
    H = H4 // 4
    return pl.pallas_call(
        _bilstm_seq_kernel,
        out_shape=jax.ShapeDtypeStruct((T, B, 2 * H), jnp.float32),
        grid=(1,),
        in_specs=[
            pl.BlockSpec((T, B, D), lambda i: (0, 0, 0)),
            pl.BlockSpec((2, D, H4), lambda i: (0, 0, 0)),
            pl.BlockSpec((2, H, H4), lambda i: (0, 0, 0)),
            pl.BlockSpec((2, 1, H4), lambda i: (0, 0, 0)),
        ],
        out_specs=pl.BlockSpec((T, B, 2 * H), lambda i: (0, 0, 0)),
        scratch_shapes=[
            pltpu.VMEM((T, B, H), jnp.float32),   # forward h sequence
            pltpu.VMEM((T, B, H), jnp.float32),   # reverse h sequence
        ],
        compiler_params=pltpu.CompilerParams(
            dimension_semantics=("arbitrary",)),
    )(x_tbd, wih, whh, bias)


# -----------------------------------------------------------------------------
# Fused bidirectional LSTM layer (layer 1) + relu + max-pool over time + dense
# head.  The (T, B, 2H) layer-1 activations never leave VMEM/vregs; only the
# (B, C) logits are written to HBM.
# -----------------------------------------------------------------------------
def _bilstm_pool_dense_kernel(x_ref, wih_ref, whh_ref, b_ref,
                              wd_ref, bd_ref, out_ref):
    T, B, _ = x_ref.shape
    H = whh_ref.shape[1]

    def body(t, carry):
        h_f, c_f, h_r, c_r, mx_f, mx_r = carry
        x_f = x_ref[t].astype(jnp.float32)
        x_r = x_ref[T - 1 - t].astype(jnp.float32)
        h_f, c_f = _lstm_cell(x_f, h_f, c_f, wih_ref[0], whh_ref[0], b_ref[0])
        h_r, c_r = _lstm_cell(x_r, h_r, c_r, wih_ref[1], whh_ref[1], b_ref[1])
        # relu + running max over time (per direction; elementwise max is
        # order-independent, so the reversed visiting order is irrelevant).
        mx_f = jnp.maximum(mx_f, jnp.maximum(h_f, 0.0))
        mx_r = jnp.maximum(mx_r, jnp.maximum(h_r, 0.0))
        return h_f, c_f, h_r, c_r, mx_f, mx_r

    z = jnp.zeros((B, H), jnp.float32)
    # relu output >= 0, so 0 is a safe identity for the running max (T >= 1).
    _, _, _, _, mx_f, mx_r = lax.fori_loop(0, T, body, (z, z, z, z, z, z))

    pooled = jnp.concatenate([mx_f, mx_r], axis=-1)          # (B, 2H)
    out_ref[...] = (jnp.dot(pooled, wd_ref[...],
                            preferred_element_type=jnp.float32)
                    + bd_ref[...]).astype(out_ref.dtype)


def bilstm_pool_dense_pallas(x_tbd, wih, whh, bias, w_dense, b_dense):
    """x_tbd: (T, B, 2H); w_dense: (2H, C); returns (B, C) logits."""
    T, B, D = x_tbd.shape
    H4 = wih.shape[-1]
    H = H4 // 4
    C = w_dense.shape[-1]
    return pl.pallas_call(
        _bilstm_pool_dense_kernel,
        out_shape=jax.ShapeDtypeStruct((B, C), jnp.float32),
        grid=(1,),
        in_specs=[
            pl.BlockSpec((T, B, D), lambda i: (0, 0, 0)),
            pl.BlockSpec((2, D, H4), lambda i: (0, 0, 0)),
            pl.BlockSpec((2, H, H4), lambda i: (0, 0, 0)),
            pl.BlockSpec((2, 1, H4), lambda i: (0, 0, 0)),
            pl.BlockSpec((2 * H, C), lambda i: (0, 0)),
            pl.BlockSpec((1, C), lambda i: (0, 0)),
        ],
        out_specs=pl.BlockSpec((B, C), lambda i: (0, 0)),
        compiler_params=pltpu.CompilerParams(
            dimension_semantics=("arbitrary",)),
    )(x_tbd, wih, whh, bias, w_dense, b_dense)


# -----------------------------------------------------------------------------
# Parameter init (deterministic, PyTorch-like uniform(-1/sqrt(H), 1/sqrt(H))).
# Weights are stored in the kernel layout: transposed, bias-fused, and stacked
# over the two directions, so the jit hot path contains no transposes.
# -----------------------------------------------------------------------------
def init_params(key, embedding_dim, hidden_dim, vocab_size, n_classes):
    H, E, C = hidden_dim, embedding_dim, n_classes
    k = 1.0 / jnp.sqrt(jnp.float32(H))
    params = {}
    keys = jax.random.split(key, 32)
    ki = iter(keys)

    params["embedding"] = jax.random.normal(next(ki), (vocab_size, E),
                                            dtype=jnp.float32)

    for layer in range(2):
        in_dim = E if layer == 0 else 2 * H
        wih_list, whh_list, b_list = [], [], []
        for _direction in range(2):                         # 0=fwd, 1=rev
            w_ih = jax.random.uniform(next(ki), (4 * H, in_dim),
                                      minval=-k, maxval=k, dtype=jnp.float32)
            w_hh = jax.random.uniform(next(ki), (4 * H, H),
                                      minval=-k, maxval=k, dtype=jnp.float32)
            b_ih = jax.random.uniform(next(ki), (4 * H,),
                                      minval=-k, maxval=k, dtype=jnp.float32)
            b_hh = jax.random.uniform(next(ki), (4 * H,),
                                      minval=-k, maxval=k, dtype=jnp.float32)
            wih_list.append(jnp.transpose(w_ih))            # (in_dim, 4H)
            whh_list.append(jnp.transpose(w_hh))            # (H, 4H)
            b_list.append((b_ih + b_hh).reshape(1, 4 * H))  # (1, 4H)
        params[f"l{layer}_wih"] = jnp.stack(wih_list, axis=0)   # (2, in_dim, 4H)
        params[f"l{layer}_whh"] = jnp.stack(whh_list, axis=0)   # (2, H, 4H)
        params[f"l{layer}_b"] = jnp.stack(b_list, axis=0)       # (2, 1, 4H)

    kd = 1.0 / jnp.sqrt(jnp.float32(2 * H))
    w_dense = jax.random.uniform(next(ki), (C, 2 * H),
                                 minval=-kd, maxval=kd, dtype=jnp.float32)
    b_dense = jax.random.uniform(next(ki), (C,),
                                 minval=-kd, maxval=kd, dtype=jnp.float32)
    params["dense_w"] = jnp.transpose(w_dense)              # (2H, C)
    params["dense_b"] = b_dense.reshape(1, C)               # (1, C)
    return params


# -----------------------------------------------------------------------------
# Full forward pass matching LSTMBase.forward.
# -----------------------------------------------------------------------------
def lstm_base_forward(params, sentence):
    # Embedding lookup (gather) kept as plain-JAX glue.
    embeds = jnp.take(params["embedding"], sentence, axis=0)     # (B, T, E)
    # Dropout(0.1): identity at inference.  TODO(synk): training-mode dropout.
    x = jnp.transpose(embeds, (1, 0, 2)).astype(jnp.float32)     # (T, B, E)

    # Layer 0: fused bidirectional LSTM -> (T, B, 2H) written directly.
    x = bilstm_seq_pallas(x, params["l0_wih"], params["l0_whh"],
                          params["l0_b"])
    # Layer 1: fused bidirectional LSTM + relu + max-pool over T + dense head.
    return bilstm_pool_dense_pallas(x, params["l1_wih"], params["l1_whh"],
                                    params["l1_b"], params["dense_w"],
                                    params["dense_b"])


if __name__ == "__main__":
    B, T = 2, 8
    EMBED_DIM, HIDDEN_DIM, VOCAB_SIZE, N_CLASSES = 32, 32, 50, 4

    key = jax.random.PRNGKey(0)
    kp, kx = jax.random.split(key)
    params = init_params(kp, EMBED_DIM, HIDDEN_DIM, VOCAB_SIZE, N_CLASSES)
    sentence = jax.random.randint(kx, (B, T), 0, VOCAB_SIZE, dtype=jnp.int32)

    fwd = jax.jit(functools.partial(lstm_base_forward, params))
    out = fwd(sentence)                    # (B, N_CLASSES)
    jax.block_until_ready(out)
    assert out.shape == (B, N_CLASSES)
    print("KERNEL_OK")
</pallas_src>

<mosaic_0001>
module attributes {stable_mosaic.version = 11 : i64} {
  func.func @_bilstm_seq_kernel(%arg0: i32, %arg1: memref<8x2x32xf32, #tpu.memory_space<vmem>>, %arg2: memref<2x32x128xf32, #tpu.memory_space<vmem>>, %arg3: memref<2x32x128xf32, #tpu.memory_space<vmem>>, %arg4: memref<2x1x128xf32, #tpu.memory_space<vmem>>, %arg5: memref<8x2x64xf32, #tpu.memory_space<vmem>>, %arg6: memref<8x2x32xf32, #tpu.memory_space<vmem>>, %arg7: memref<8x2x32xf32, #tpu.memory_space<vmem>>) attributes {dimension_semantics = [#tpu.dimension_semantics<arbitrary>], iteration_bounds = array<i64: 1>, scalar_prefetch = 0 : i64, scratch_operands = 2 : i64, tpu.core_type = #tpu.core_type<tc>, window_params = [{pipeline_mode = #tpu.pipeline_mode<synchronous>, transform_indices = @transform_0, window_bounds = array<i64: 8, 2, 32>}, {pipeline_mode = #tpu.pipeline_mode<synchronous>, transform_indices = @transform_1, window_bounds = array<i64: 2, 32, 128>}, {pipeline_mode = #tpu.pipeline_mode<synchronous>, transform_indices = @transform_2, window_bounds = array<i64: 2, 32, 128>}, {pipeline_mode = #tpu.pipeline_mode<synchronous>, transform_indices = @transform_3, window_bounds = array<i64: 2, 1, 128>}, {pipeline_mode = #tpu.pipeline_mode<synchronous>, transform_indices = @transform_4, window_bounds = array<i64: 8, 2, 64>}]} {
    %cst = arith.constant 0.000000e+00 : f32
    %0 = vector.broadcast %cst : f32 to vector<2x32xf32>
    %c0_i32 = arith.constant 0 : i32
    %c8_i32 = arith.constant 8 : i32
    %1 = arith.addi %c0_i32, %c8_i32 : i32
    %c1_i32 = arith.constant 1 : i32
    %2:4 = scf.for %arg8 = %c0_i32 to %1 step %c1_i32 iter_args(%arg9 = %0, %arg10 = %0, %arg11 = %0, %arg12 = %0) -> (vector<2x32xf32>, vector<2x32xf32>, vector<2x32xf32>, vector<2x32xf32>)  : i32 {
      %7 = arith.index_cast %arg8 : i32 to index
      %c0_9 = arith.constant 0 : index
      %c0_10 = arith.constant 0 : index
      %8 = vector.load %arg1[%7, %c0_9, %c0_10] : memref<8x2x32xf32, #tpu.memory_space<vmem>>, vector<1x2x32xf32>
      %9 = vector.shape_cast %8 : vector<1x2x32xf32> to vector<2x32xf32>
      %c7_i32 = arith.constant 7 : i32
      %10 = arith.subi %c7_i32, %arg8 : i32
      %11 = arith.index_cast %10 : i32 to index
      %c0_11 = arith.constant 0 : index
      %c0_12 = arith.constant 0 : index
      %12 = vector.load %arg1[%11, %c0_11, %c0_12] : memref<8x2x32xf32, #tpu.memory_space<vmem>>, vector<1x2x32xf32>
      %13 = vector.shape_cast %12 : vector<1x2x32xf32> to vector<2x32xf32>
      %c0_13 = arith.constant 0 : index
      %c0_14 = arith.constant 0 : index
      %c0_15 = arith.constant 0 : index
      %14 = vector.load %arg2[%c0_13, %c0_14, %c0_15] : memref<2x32x128xf32, #tpu.memory_space<vmem>>, vector<1x32x128xf32>
      %15 = vector.shape_cast %14 : vector<1x32x128xf32> to vector<32x128xf32>
      %c0_16 = arith.constant 0 : index
      %c0_17 = arith.constant 0 : index
      %c0_18 = arith.constant 0 : index
      %16 = vector.load %arg3[%c0_16, %c0_17, %c0_18] : memref<2x32x128xf32, #tpu.memory_space<vmem>>, vector<1x32x128xf32>
      %17 = vector.shape_cast %16 : vector<1x32x128xf32> to vector<32x128xf32>
      %c0_19 = arith.constant 0 : index
      %c0_20 = arith.constant 0 : index
      %c0_21 = arith.constant 0 : index
      %18 = vector.load %arg4[%c0_19, %c0_20, %c0_21] : memref<2x1x128xf32, #tpu.memory_space<vmem>>, vector<1x1x128xf32>
      %19 = vector.shape_cast %18 : vector<1x1x128xf32> to vector<1x128xf32>
      %cst_22 = arith.constant dense<0.000000e+00> : vector<2x128xf32>
      %20 = tpu.matmul %9, %15, %cst_22 {dimension_numbers = #tpu.dot_dimension_numbers<[1], [0], [0], [1], [0, 0, 1, 1], [], []>} : vector<2x32xf32>, vector<32x128xf32>, vector<2x128xf32> -> vector<2x128xf32>
      %cst_23 = arith.constant dense<0.000000e+00> : vector<2x128xf32>
      %21 = tpu.matmul %arg9, %17, %cst_23 {dimension_numbers = #tpu.dot_dimension_numbers<[1], [0], [0], [1], [0, 0, 1, 1], [], []>} : vector<2x32xf32>, vector<32x128xf32>, vector<2x128xf32> -> vector<2x128xf32>
      %22 = arith.addf %20, %21 : vector<2x128xf32>
      %23 = vector.broadcast %19 : vector<1x128xf32> to vector<2x128xf32>
      %24 = arith.addf %22, %23 : vector<2x128xf32>
      %25 = vector.extract_strided_slice %24 {offsets = [0, 0], sizes = [2, 32], strides = [1, 1]} : vector<2x128xf32> to vector<2x32xf32>
      %26 = arith.negf %25 : vector<2x32xf32>
      %27 = math.exp %26 : vector<2x32xf32>
      %cst_24 = arith.constant 1.000000e+00 : f32
      %28 = vector.broadcast %cst_24 : f32 to vector<2x32xf32>
      %29 = arith.addf %28, %27 : vector<2x32xf32>
      %30 = arith.divf %28, %29 : vector<2x32xf32>
      %31 = vector.extract_strided_slice %24 {offsets = [0, 32], sizes = [2, 32], strides = [1, 1]} : vector<2x128xf32> to vector<2x32xf32>
      %32 = arith.negf %31 : vector<2x32xf32>
      %33 = math.exp %32 : vector<2x32xf32>
      %cst_25 = arith.constant 1.000000e+00 : f32
      %34 = vector.broadcast %cst_25 : f32 to vector<2x32xf32>
      %35 = arith.addf %34, %33 : vector<2x32xf32>
      %36 = arith.divf %34, %35 : vector<2x32xf32>
      %37 = vector.extract_strided_slice %24 {offsets = [0, 64], sizes = [2, 32], strides = [1, 1]} : vector<2x128xf32> to vector<2x32xf32>
      %38 = math.tanh %37 : vector<2x32xf32>
      %39 = vector.extract_strided_slice %24 {offsets = [0, 96], sizes = [2, 32], strides = [1, 1]} : vector<2x128xf32> to vector<2x32xf32>
      %40 = arith.negf %39 : vector<2x32xf32>
      %41 = math.exp %40 : vector<2x32xf32>
      %cst_26 = arith.constant 1.000000e+00 : f32
      %42 = vector.broadcast %cst_26 : f32 to vector<2x32xf32>
      %43 = arith.addf %42, %41 : vector<2x32xf32>
      %44 = arith.divf %42, %43 : vector<2x32xf32>
      %45 = arith.mulf %36, %arg10 : vector<2x32xf32>
      %46 = arith.mulf %30, %38 : vector<2x32xf32>
      %47 = arith.addf %45, %46 : vector<2x32xf32>
      %48 = math.tanh %47 : vector<2x32xf32>
      %49 = arith.mulf %44, %48 : vector<2x32xf32>
      %c1 = arith.constant 1 : index
      %c0_27 = arith.constant 0 : index
      %c0_28 = arith.constant 0 : index
      %50 = vector.load %arg2[%c1, %c0_27, %c0_28] : memref<2x32x128xf32, #tpu.memory_space<vmem>>, vector<1x32x128xf32>
      %51 = vector.shape_cast %50 : vector<1x32x128xf32> to vector<32x128xf32>
      %c1_29 = arith.constant 1 : index
      %c0_30 = arith.constant 0 : index
      %c0_31 = arith.constant 0 : index
      %52 = vector.load %arg3[%c1_29, %c0_30, %c0_31] : memref<2x32x128xf32, #tpu.memory_space<vmem>>, vector<1x32x128xf32>
      %53 = vector.shape_cast %52 : vector<1x32x128xf32> to vector<32x128xf32>
      %c1_32 = arith.constant 1 : index
      %c0_33 = arith.constant 0 : index
      %c0_34 = arith.constant 0 : index
      %54 = vector.load %arg4[%c1_32, %c0_33, %c0_34] : memref<2x1x128xf32, #tpu.memory_space<vmem>>, vector<1x1x128xf32>
      %55 = vector.shape_cast %54 : vector<1x1x128xf32> to vector<1x128xf32>
      %cst_35 = arith.constant dense<0.000000e+00> : vector<2x128xf32>
      %56 = tpu.matmul %13, %51, %cst_35 {dimension_numbers = #tpu.dot_dimension_numbers<[1], [0], [0], [1], [0, 0, 1, 1], [], []>} : vector<2x32xf32>, vector<32x128xf32>, vector<2x128xf32> -> vector<2x128xf32>
      %cst_36 = arith.constant dense<0.000000e+00> : vector<2x128xf32>
      %57 = tpu.matmul %arg11, %53, %cst_36 {dimension_numbers = #tpu.dot_dimension_numbers<[1], [0], [0], [1], [0, 0, 1, 1], [], []>} : vector<2x32xf32>, vector<32x128xf32>, vector<2x128xf32> -> vector<2x128xf32>
      %58 = arith.addf %56, %57 : vector<2x128xf32>
      %59 = vector.broadcast %55 : vector<1x128xf32> to vector<2x128xf32>
      %60 = arith.addf %58, %59 : vector<2x128xf32>
      %61 = vector.extract_strided_slice %60 {offsets = [0, 0], sizes = [2, 32], strides = [1, 1]} : vector<2x128xf32> to vector<2x32xf32>
      %62 = arith.negf %61 : vector<2x32xf32>
      %63 = math.exp %62 : vector<2x32xf32>
      %cst_37 = arith.constant 1.000000e+00 : f32
      %64 = vector.broadcast %cst_37 : f32 to vector<2x32xf32>
      %65 = arith.addf %64, %63 : vector<2x32xf32>
      %66 = arith.divf %64, %65 : vector<2x32xf32>
      %67 = vector.extract_strided_slice %60 {offsets = [0, 32], sizes = [2, 32], strides = [1, 1]} : vector<2x128xf32> to vector<2x32xf32>
      %68 = arith.negf %67 : vector<2x32xf32>
      %69 = math.exp %68 : vector<2x32xf32>
      %cst_38 = arith.constant 1.000000e+00 : f32
      %70 = vector.broadcast %cst_38 : f32 to vector<2x32xf32>
      %71 = arith.addf %70, %69 : vector<2x32xf32>
      %72 = arith.divf %70, %71 : vector<2x32xf32>
      %73 = vector.extract_strided_slice %60 {offsets = [0, 64], sizes = [2, 32], strides = [1, 1]} : vector<2x128xf32> to vector<2x32xf32>
      %74 = math.tanh %73 : vector<2x32xf32>
      %75 = vector.extract_strided_slice %60 {offsets = [0, 96], sizes = [2, 32], strides = [1, 1]} : vector<2x128xf32> to vector<2x32xf32>
      %76 = arith.negf %75 : vector<2x32xf32>
      %77 = math.exp %76 : vector<2x32xf32>
      %cst_39 = arith.constant 1.000000e+00 : f32
      %78 = vector.broadcast %cst_39 : f32 to vector<2x32xf32>
      %79 = arith.addf %78, %77 : vector<2x32xf32>
      %80 = arith.divf %78, %79 : vector<2x32xf32>
      %81 = arith.mulf %72, %arg12 : vector<2x32xf32>
      %82 = arith.mulf %66, %74 : vector<2x32xf32>
      %83 = arith.addf %81, %82 : vector<2x32xf32>
      %84 = math.tanh %83 : vector<2x32xf32>
      %85 = arith.mulf %80, %84 : vector<2x32xf32>
      %86 = arith.index_cast %arg8 : i32 to index
      %c0_40 = arith.constant 0 : index
      %c0_41 = arith.constant 0 : index
      %87 = vector.load %arg6[%86, %c0_40, %c0_41] : memref<8x2x32xf32, #tpu.memory_space<vmem>>, vector<1x2x32xf32>
      %88 = vector.shape_cast %87 : vector<1x2x32xf32> to vector<2x32xf32>
      %89 = vector.shape_cast %49 : vector<2x32xf32> to vector<1x2x32xf32>
      tpu.vector_store %arg6[%86, %c0_40, %c0_41], %89 {strides = array<i32>} : memref<8x2x32xf32, #tpu.memory_space<vmem>>, vector<1x2x32xf32>,
      %c7_i32_42 = arith.constant 7 : i32
      %90 = arith.subi %c7_i32_42, %arg8 : i32
      %91 = arith.index_cast %90 : i32 to index
      %c0_43 = arith.constant 0 : index
      %c0_44 = arith.constant 0 : index
      %92 = vector.load %arg7[%91, %c0_43, %c0_44] : memref<8x2x32xf32, #tpu.memory_space<vmem>>, vector<1x2x32xf32>
      %93 = vector.shape_cast %92 : vector<1x2x32xf32> to vector<2x32xf32>
      %94 = vector.shape_cast %85 : vector<2x32xf32> to vector<1x2x32xf32>
      tpu.vector_store %arg7[%91, %c0_43, %c0_44], %94 {strides = array<i32>} : memref<8x2x32xf32, #tpu.memory_space<vmem>>, vector<1x2x32xf32>,
      scf.yield %49, %47, %85, %83 : vector<2x32xf32>, vector<2x32xf32>, vector<2x32xf32>, vector<2x32xf32>
    }
    %c8_i32_0 = arith.constant 8 : i32
    %c0 = arith.constant 0 : index
    %c0_1 = arith.constant 0 : index
    %c0_2 = arith.constant 0 : index
    %3 = vector.load %arg6[%c0, %c0_1, %c0_2] : memref<8x2x32xf32, #tpu.memory_space<vmem>>, vector<8x2x32xf32>
    %c0_3 = arith.constant 0 : index
    %c0_4 = arith.constant 0 : index
    %c0_5 = arith.constant 0 : index
    %4 = vector.load %arg7[%c0_3, %c0_4, %c0_5] : memref<8x2x32xf32, #tpu.memory_space<vmem>>, vector<8x2x32xf32>
    %5 = tpu.concatenate %3, %4 in 2 : vector<8x2x32xf32>, vector<8x2x32xf32> -> vector<8x2x64xf32>
    %c0_6 = arith.constant 0 : index
    %c0_7 = arith.constant 0 : index
    %c0_8 = arith.constant 0 : index
    %6 = vector.load %arg5[%c0_6, %c0_7, %c0_8] : memref<8x2x64xf32, #tpu.memory_space<vmem>>, vector<8x2x64xf32>
    tpu.vector_store %arg5[%c0_6, %c0_7, %c0_8], %5 {strides = array<i32>} : memref<8x2x64xf32, #tpu.memory_space<vmem>>, vector<8x2x64xf32>,
    return
  }
  func.func @transform_0(%arg0: i32) -> (i32, i32, i32) {
    %c0_i32 = arith.constant 0 : i32
    %c0_i32_0 = arith.constant 0 : i32
    %c0_i32_1 = arith.constant 0 : i32
    %c0_i32_2 = arith.constant 0 : i32
    return %c0_i32, %c0_i32_0, %c0_i32_1 : i32, i32, i32
  }
  func.func @transform_1(%arg0: i32) -> (i32, i32, i32) {
    %c0_i32 = arith.constant 0 : i32
    %c0_i32_0 = arith.constant 0 : i32
    %c0_i32_1 = arith.constant 0 : i32
    %c0_i32_2 = arith.constant 0 : i32
    return %c0_i32, %c0_i32_0, %c0_i32_1 : i32, i32, i32
  }
  func.func @transform_2(%arg0: i32) -> (i32, i32, i32) {
    %c0_i32 = arith.constant 0 : i32
    %c0_i32_0 = arith.constant 0 : i32
    %c0_i32_1 = arith.constant 0 : i32
    %c0_i32_2 = arith.constant 0 : i32
    return %c0_i32, %c0_i32_0, %c0_i32_1 : i32, i32, i32
  }
  func.func @transform_3(%arg0: i32) -> (i32, i32, i32) {
    %c0_i32 = arith.constant 0 : i32
    %c0_i32_0 = arith.constant 0 : i32
    %c0_i32_1 = arith.constant 0 : i32
    %c0_i32_2 = arith.constant 0 : i32
    return %c0_i32, %c0_i32_0, %c0_i32_1 : i32, i32, i32
  }
  func.func @transform_4(%arg0: i32) -> (i32, i32, i32) {
    %c0_i32 = arith.constant 0 : i32
    %c0_i32_0 = arith.constant 0 : i32
    %c0_i32_1 = arith.constant 0 : i32
    %c0_i32_2 = arith.constant 0 : i32
    return %c0_i32, %c0_i32_0, %c0_i32_1 : i32, i32, i32
  }
}

module attributes {stable_mosaic.version = 11 : i64} {
  func.func @_bilstm_pool_dense_kernel(%arg0: i32, %arg1: memref<8x2x64xf32, #tpu.memory_space<vmem>>, %arg2: memref<2x64x128xf32, #tpu.memory_space<vmem>>, %arg3: memref<2x32x128xf32, #tpu.memory_space<vmem>>, %arg4: memref<2x1x128xf32, #tpu.memory_space<vmem>>, %arg5: memref<64x4xf32, #tpu.memory_space<vmem>>, %arg6: memref<1x4xf32, #tpu.memory_space<vmem>>, %arg7: memref<2x4xf32, #tpu.memory_space<vmem>>) attributes {dimension_semantics = [#tpu.dimension_semantics<arbitrary>], iteration_bounds = array<i64: 1>, scalar_prefetch = 0 : i64, scratch_operands = 0 : i64, tpu.core_type = #tpu.core_type<tc>, window_params = [{pipeline_mode = #tpu.pipeline_mode<synchronous>, transform_indices = @transform_0, window_bounds = array<i64: 8, 2, 64>}, {pipeline_mode = #tpu.pipeline_mode<synchronous>, transform_indices = @transform_1, window_bounds = array<i64: 2, 64, 128>}, {pipeline_mode = #tpu.pipeline_mode<synchronous>, transform_indices = @transform_2, window_bounds = array<i64: 2, 32, 128>}, {pipeline_mode = #tpu.pipeline_mode<synchronous>, transform_indices = @transform_3, window_bounds = array<i64: 2, 1, 128>}, {pipeline_mode = #tpu.pipeline_mode<synchronous>, transform_indices = @transform_4, window_bounds = array<i64: 64, 4>}, {pipeline_mode = #tpu.pipeline_mode<synchronous>, transform_indices = @transform_5, window_bounds = array<i64: 1, 4>}, {pipeline_mode = #tpu.pipeline_mode<synchronous>, transform_indices = @transform_6, window_bounds = array<i64: 2, 4>}]} {
    %cst = arith.constant 0.000000e+00 : f32
    %0 = vector.broadcast %cst : f32 to vector<2x32xf32>
    %c0_i32 = arith.constant 0 : i32
    %c8_i32 = arith.constant 8 : i32
    %1 = arith.addi %c0_i32, %c8_i32 : i32
    %c1_i32 = arith.constant 1 : i32
    %2:6 = scf.for %arg8 = %c0_i32 to %1 step %c1_i32 iter_args(%arg9 = %0, %arg10 = %0, %arg11 = %0, %arg12 = %0, %arg13 = %0, %arg14 = %0) -> (vector<2x32xf32>, vector<2x32xf32>, vector<2x32xf32>, vector<2x32xf32>, vector<2x32xf32>, vector<2x32xf32>)  : i32 {
      %10 = arith.index_cast %arg8 : i32 to index
      %c0_7 = arith.constant 0 : index
      %c0_8 = arith.constant 0 : index
      %11 = vector.load %arg1[%10, %c0_7, %c0_8] : memref<8x2x64xf32, #tpu.memory_space<vmem>>, vector<1x2x64xf32>
      %12 = vector.shape_cast %11 : vector<1x2x64xf32> to vector<2x64xf32>
      %c7_i32 = arith.constant 7 : i32
      %13 = arith.subi %c7_i32, %arg8 : i32
      %14 = arith.index_cast %13 : i32 to index
      %c0_9 = arith.constant 0 : index
      %c0_10 = arith.constant 0 : index
      %15 = vector.load %arg1[%14, %c0_9, %c0_10] : memref<8x2x64xf32, #tpu.memory_space<vmem>>, vector<1x2x64xf32>
      %16 = vector.shape_cast %15 : vector<1x2x64xf32> to vector<2x64xf32>
      %c0_11 = arith.constant 0 : index
      %c0_12 = arith.constant 0 : index
      %c0_13 = arith.constant 0 : index
      %17 = vector.load %arg2[%c0_11, %c0_12, %c0_13] : memref<2x64x128xf32, #tpu.memory_space<vmem>>, vector<1x64x128xf32>
      %18 = vector.shape_cast %17 : vector<1x64x128xf32> to vector<64x128xf32>
      %c0_14 = arith.constant 0 : index
      %c0_15 = arith.constant 0 : index
      %c0_16 = arith.constant 0 : index
      %19 = vector.load %arg3[%c0_14, %c0_15, %c0_16] : memref<2x32x128xf32, #tpu.memory_space<vmem>>, vector<1x32x128xf32>
      %20 = vector.shape_cast %19 : vector<1x32x128xf32> to vector<32x128xf32>
      %c0_17 = arith.constant 0 : index
      %c0_18 = arith.constant 0 : index
      %c0_19 = arith.constant 0 : index
      %21 = vector.load %arg4[%c0_17, %c0_18, %c0_19] : memref<2x1x128xf32, #tpu.memory_space<vmem>>, vector<1x1x128xf32>
      %22 = vector.shape_cast %21 : vector<1x1x128xf32> to vector<1x128xf32>
      %cst_20 = arith.constant dense<0.000000e+00> : vector<2x128xf32>
      %23 = tpu.matmul %12, %18, %cst_20 {dimension_numbers = #tpu.dot_dimension_numbers<[1], [0], [0], [1], [0, 0, 1, 1], [], []>} : vector<2x64xf32>, vector<64x128xf32>, vector<2x128xf32> -> vector<2x128xf32>
      %cst_21 = arith.constant dense<0.000000e+00> : vector<2x128xf32>
      %24 = tpu.matmul %arg9, %20, %cst_21 {dimension_numbers = #tpu.dot_dimension_numbers<[1], [0], [0], [1], [0, 0, 1, 1], [], []>} : vector<2x32xf32>, vector<32x128xf32>, vector<2x128xf32> -> vector<2x128xf32>
      %25 = arith.addf %23, %24 : vector<2x128xf32>
      %26 = vector.broadcast %22 : vector<1x128xf32> to vector<2x128xf32>
      %27 = arith.addf %25, %26 : vector<2x128xf32>
      %28 = vector.extract_strided_slice %27 {offsets = [0, 0], sizes = [2, 32], strides = [1, 1]} : vector<2x128xf32> to vector<2x32xf32>
      %29 = arith.negf %28 : vector<2x32xf32>
      %30 = math.exp %29 : vector<2x32xf32>
      %cst_22 = arith.constant 1.000000e+00 : f32
      %31 = vector.broadcast %cst_22 : f32 to vector<2x32xf32>
      %32 = arith.addf %31, %30 : vector<2x32xf32>
      %33 = arith.divf %31, %32 : vector<2x32xf32>
      %34 = vector.extract_strided_slice %27 {offsets = [0, 32], sizes = [2, 32], strides = [1, 1]} : vector<2x128xf32> to vector<2x32xf32>
      %35 = arith.negf %34 : vector<2x32xf32>
      %36 = math.exp %35 : vector<2x32xf32>
      %cst_23 = arith.constant 1.000000e+00 : f32
      %37 = vector.broadcast %cst_23 : f32 to vector<2x32xf32>
      %38 = arith.addf %37, %36 : vector<2x32xf32>
      %39 = arith.divf %37, %38 : vector<2x32xf32>
      %40 = vector.extract_strided_slice %27 {offsets = [0, 64], sizes = [2, 32], strides = [1, 1]} : vector<2x128xf32> to vector<2x32xf32>
      %41 = math.tanh %40 : vector<2x32xf32>
      %42 = vector.extract_strided_slice %27 {offsets = [0, 96], sizes = [2, 32], strides = [1, 1]} : vector<2x128xf32> to vector<2x32xf32>
      %43 = arith.negf %42 : vector<2x32xf32>
      %44 = math.exp %43 : vector<2x32xf32>
      %cst_24 = arith.constant 1.000000e+00 : f32
      %45 = vector.broadcast %cst_24 : f32 to vector<2x32xf32>
      %46 = arith.addf %45, %44 : vector<2x32xf32>
      %47 = arith.divf %45, %46 : vector<2x32xf32>
      %48 = arith.mulf %39, %arg10 : vector<2x32xf32>
      %49 = arith.mulf %33, %41 : vector<2x32xf32>
      %50 = arith.addf %48, %49 : vector<2x32xf32>
      %51 = math.tanh %50 : vector<2x32xf32>
      %52 = arith.mulf %47, %51 : vector<2x32xf32>
      %c1 = arith.constant 1 : index
      %c0_25 = arith.constant 0 : index
      %c0_26 = arith.constant 0 : index
      %53 = vector.load %arg2[%c1, %c0_25, %c0_26] : memref<2x64x128xf32, #tpu.memory_space<vmem>>, vector<1x64x128xf32>
      %54 = vector.shape_cast %53 : vector<1x64x128xf32> to vector<64x128xf32>
      %c1_27 = arith.constant 1 : index
      %c0_28 = arith.constant 0 : index
      %c0_29 = arith.constant 0 : index
      %55 = vector.load %arg3[%c1_27, %c0_28, %c0_29] : memref<2x32x128xf32, #tpu.memory_space<vmem>>, vector<1x32x128xf32>
      %56 = vector.shape_cast %55 : vector<1x32x128xf32> to vector<32x128xf32>
      %c1_30 = arith.constant 1 : index
      %c0_31 = arith.constant 0 : index
      %c0_32 = arith.constant 0 : index
      %57 = vector.load %arg4[%c1_30, %c0_31, %c0_32] : memref<2x1x128xf32, #tpu.memory_space<vmem>>, vector<1x1x128xf32>
      %58 = vector.shape_cast %57 : vector<1x1x128xf32> to vector<1x128xf32>
      %cst_33 = arith.constant dense<0.000000e+00> : vector<2x128xf32>
      %59 = tpu.matmul %16, %54, %cst_33 {dimension_numbers = #tpu.dot_dimension_numbers<[1], [0], [0], [1], [0, 0, 1, 1], [], []>} : vector<2x64xf32>, vector<64x128xf32>, vector<2x128xf32> -> vector<2x128xf32>
      %cst_34 = arith.constant dense<0.000000e+00> : vector<2x128xf32>
      %60 = tpu.matmul %arg11, %56, %cst_34 {dimension_numbers = #tpu.dot_dimension_numbers<[1], [0], [0], [1], [0, 0, 1, 1], [], []>} : vector<2x32xf32>, vector<32x128xf32>, vector<2x128xf32> -> vector<2x128xf32>
      %61 = arith.addf %59, %60 : vector<2x128xf32>
      %62 = vector.broadcast %58 : vector<1x128xf32> to vector<2x128xf32>
      %63 = arith.addf %61, %62 : vector<2x128xf32>
      %64 = vector.extract_strided_slice %63 {offsets = [0, 0], sizes = [2, 32], strides = [1, 1]} : vector<2x128xf32> to vector<2x32xf32>
      %65 = arith.negf %64 : vector<2x32xf32>
      %66 = math.exp %65 : vector<2x32xf32>
      %cst_35 = arith.constant 1.000000e+00 : f32
      %67 = vector.broadcast %cst_35 : f32 to vector<2x32xf32>
      %68 = arith.addf %67, %66 : vector<2x32xf32>
      %69 = arith.divf %67, %68 : vector<2x32xf32>
      %70 = vector.extract_strided_slice %63 {offsets = [0, 32], sizes = [2, 32], strides = [1, 1]} : vector<2x128xf32> to vector<2x32xf32>
      %71 = arith.negf %70 : vector<2x32xf32>
      %72 = math.exp %71 : vector<2x32xf32>
      %cst_36 = arith.constant 1.000000e+00 : f32
      %73 = vector.broadcast %cst_36 : f32 to vector<2x32xf32>
      %74 = arith.addf %73, %72 : vector<2x32xf32>
      %75 = arith.divf %73, %74 : vector<2x32xf32>
      %76 = vector.extract_strided_slice %63 {offsets = [0, 64], sizes = [2, 32], strides = [1, 1]} : vector<2x128xf32> to vector<2x32xf32>
      %77 = math.tanh %76 : vector<2x32xf32>
      %78 = vector.extract_strided_slice %63 {offsets = [0, 96], sizes = [2, 32], strides = [1, 1]} : vector<2x128xf32> to vector<2x32xf32>
      %79 = arith.negf %78 : vector<2x32xf32>
      %80 = math.exp %79 : vector<2x32xf32>
      %cst_37 = arith.constant 1.000000e+00 : f32
      %81 = vector.broadcast %cst_37 : f32 to vector<2x32xf32>
      %82 = arith.addf %81, %80 : vector<2x32xf32>
      %83 = arith.divf %81, %82 : vector<2x32xf32>
      %84 = arith.mulf %75, %arg12 : vector<2x32xf32>
      %85 = arith.mulf %69, %77 : vector<2x32xf32>
      %86 = arith.addf %84, %85 : vector<2x32xf32>
      %87 = math.tanh %86 : vector<2x32xf32>
      %88 = arith.mulf %83, %87 : vector<2x32xf32>
      %cst_38 = arith.constant 0.000000e+00 : f32
      %89 = vector.broadcast %cst_38 : f32 to vector<2x32xf32>
      %90 = arith.maximumf %52, %89 : vector<2x32xf32>
      %91 = arith.maximumf %arg13, %90 : vector<2x32xf32>
      %cst_39 = arith.constant 0.000000e+00 : f32
      %92 = vector.broadcast %cst_39 : f32 to vector<2x32xf32>
      %93 = arith.maximumf %88, %92 : vector<2x32xf32>
      %94 = arith.maximumf %arg14, %93 : vector<2x32xf32>
      scf.yield %52, %50, %88, %86, %91, %94 : vector<2x32xf32>, vector<2x32xf32>, vector<2x32xf32>, vector<2x32xf32>, vector<2x32xf32>, vector<2x32xf32>
    }
    %c8_i32_0 = arith.constant 8 : i32
    %3 = tpu.concatenate %2#4, %2#5 in 1 : vector<2x32xf32>, vector<2x32xf32> -> vector<2x64xf32>
    %c0 = arith.constant 0 : index
    %c0_1 = arith.constant 0 : index
    %4 = vector.load %arg5[%c0, %c0_1] : memref<64x4xf32, #tpu.memory_space<vmem>>, vector<64x4xf32>
    %cst_2 = arith.constant dense<0.000000e+00> : vector<2x4xf32>
    %5 = tpu.matmul %3, %4, %cst_2 {dimension_numbers = #tpu.dot_dimension_numbers<[1], [0], [0], [1], [0, 0, 1, 1], [], []>} : vector<2x64xf32>, vector<64x4xf32>, vector<2x4xf32> -> vector<2x4xf32>
    %c0_3 = arith.constant 0 : index
    %c0_4 = arith.constant 0 : index
    %6 = vector.load %arg6[%c0_3, %c0_4] : memref<1x4xf32, #tpu.memory_space<vmem>>, vector<1x4xf32>
    %7 = vector.broadcast %6 : vector<1x4xf32> to vector<2x4xf32>
    %8 = arith.addf %5, %7 : vector<2x4xf32>
    %c0_5 = arith.constant 0 : index
    %c0_6 = arith.constant 0 : index
    %9 = vector.load %arg7[%c0_5, %c0_6] : memref<2x4xf32, #tpu.memory_space<vmem>>, vector<2x4xf32>
    tpu.vector_store %arg7[%c0_5, %c0_6], %8 {strides = array<i32>} : memref<2x4xf32, #tpu.memory_space<vmem>>, vector<2x4xf32>,
    return
  }
  func.func @transform_0(%arg0: i32) -> (i32, i32, i32) {
    %c0_i32 = arith.constant 0 : i32
    %c0_i32_0 = arith.constant 0 : i32
    %c0_i32_1 = arith.constant 0 : i32
    %c0_i32_2 = arith.constant 0 : i32
    return %c0_i32, %c0_i32_0, %c0_i32_1 : i32, i32, i32
  }
  func.func @transform_1(%arg0: i32) -> (i32, i32, i32) {
    %c0_i32 = arith.constant 0 : i32
    %c0_i32_0 = arith.constant 0 : i32
    %c0_i32_1 = arith.constant 0 : i32
    %c0_i32_2 = arith.constant 0 : i32
    return %c0_i32, %c0_i32_0, %c0_i32_1 : i32, i32, i32
  }
  func.func @transform_2(%arg0: i32) -> (i32, i32, i32) {
    %c0_i32 = arith.constant 0 : i32
    %c0_i32_0 = arith.constant 0 : i32
    %c0_i32_1 = arith.constant 0 : i32
    %c0_i32_2 = arith.constant 0 : i32
    return %c0_i32, %c0_i32_0, %c0_i32_1 : i32, i32, i32
  }
  func.func @transform_3(%arg0: i32) -> (i32, i32, i32) {
    %c0_i32 = arith.constant 0 : i32
    %c0_i32_0 = arith.constant 0 : i32
    %c0_i32_1 = arith.constant 0 : i32
    %c0_i32_2 = arith.constant 0 : i32
    return %c0_i32, %c0_i32_0, %c0_i32_1 : i32, i32, i32
  }
  func.func @transform_4(%arg0: i32) -> (i32, i32) {
    %c0_i32 = arith.constant 0 : i32
    %c0_i32_0 = arith.constant 0 : i32
    %c0_i32_1 = arith.constant 0 : i32
    return %c0_i32, %c0_i32_0 : i32, i32
  }
  func.func @transform_5(%arg0: i32) -> (i32, i32) {
    %c0_i32 = arith.constant 0 : i32
    %c0_i32_0 = arith.constant 0 : i32
    %c0_i32_1 = arith.constant 0 : i32
    return %c0_i32, %c0_i32_0 : i32, i32
  }
  func.func @transform_6(%arg0: i32) -> (i32, i32) {
    %c0_i32 = arith.constant 0 : i32
    %c0_i32_0 = arith.constant 0 : i32
    %c0_i32_1 = arith.constant 0 : i32
    return %c0_i32, %c0_i32_0 : i32, i32
  }
}

</mosaic_0001>

<bundles_post_ra>
// kernel: lstm_base_forward.2
= control target key start
LH: loop header
LB: loop body
LE: loop exit
PB: predicated region body
PF: predicated region fallthrough
CT: control target
= control target key end

     0   :  { %9 = vsyncpa [#allocation5], 0  ;;  %s690_s0 = inlined_call_operand.vmem [shape: f32[8,2,32], index: 0, kind: input, shape index: {}]   ;;  %s691_s1 = inlined_call_operand.hbm [shape: f32[2,32,128], index: 1, kind: input, shape index: {}]   ;;  %s692_s2 = inlined_call_operand.hbm [shape: f32[2,32,128], index: 2, kind: input, shape index: {}]   ;;  %s693_s3 = inlined_call_operand.vmem [shape: f32[2,1,128], index: 3, kind: input, shape index: {}]   ;;  %s694_s4 = inlined_call_operand.vmem [shape: f32[8,2,64], index: 4, kind: output, shape index: {}]  }
   0x1   :  { %s17_s17 = sshll.u32 %s691_s1, 4  ;;  %s18_s17 = int_to_ptr.hbm [resolvable:$true] %s17_s17 }
   0x2   :  { %10 = vsyncpa [#allocation7], 0  ;;  %s542_s18 = smov [#allocation4]   ;;  %s30_s22 = sshll.u32 %s692_s2, 4  ;;  %s31_s22 = int_to_ptr.hbm [resolvable:$true] %s30_s22 }
   0x3   :  { %s19_s19 = sshll.u32 %s542_s18, 4  ;;  %s543_s23 = smov 128   ;;  %s20_s19 = int_to_ptr.vmem [resolvable:$true] %s19_s19 }
   0x4   :  { %s544_s24 = smov 8   ;;  %s545_s25 = smov [#allocation6]  }
   0x5   :  { %25 = dma.hbm_to_vmem [thread:$0]  %s18_s17, 1024, %s20_s19, [#allocation5], %s543_s23, %s543_s23, %s544_s24  }
   0x6   :  { %s32_s26 = sshll.u32 %s545_s25, 4  ;;  %s33_s26 = int_to_ptr.vmem [resolvable:$true] %s32_s26 }
   0x7   :  { %38 = dma.hbm_to_vmem [thread:$0]  %s31_s22, 1024, %s33_s26, [#allocation7], %s543_s23, %s543_s23, %s544_s24  }
   0x8   :  { %518 = dma.done.wait [#allocation5], 1024  }
   0x9   :  { %519 = vsyncadd [#allocation5], 4294966272 }
   0xa   :  { %520 = dma.done.wait [#allocation7], 1024  }
   0xb   :  { %521 = vsyncadd [#allocation7], 4294966272  ;;  %v580_v0 = vmov 0.0   ;;  %v582_v1 = vmov 0.0   ;;  %v584_v2 = vmov 0.0   ;;  %v586_v3 = vmov 0.0  }
   0xc   :  { %s588_s1 = smov 0  }
   0xd LB: > { %v174_v4 = vld [vmem:[#allocation6 + $0x38] sm:$0xff]  ;;  %v173_v6 = vld [vmem:[#allocation6 + $0x30] sm:$0xff]  ;;  %s546_s2 = smov 32   ;;  %v172_v8 = vld [vmem:[#allocation6 + $0x28] sm:$0xff]  ;;  %s62_s27 = ssub.s32 7, %s540_s1  ;;  %vm78_vm0 = vcmask 261120   ;;  %s540_s1 = sphi %s588_s1, %s54_s1   ;;  %v536_v3 = vphi %v586_v3, %v164_v3   ;;  %v532_v2 = vphi %v584_v2, %v158_v2   ;;  %v528_v1 = vphi %v582_v1, %v265_v1   ;;  %v524_v0 = vphi %v580_v0, %v259_v0  }
   0xe   : > { %v169_v5 = vld [vmem:[#allocation4 + $0x38] sm:$0xff]  ;;  %194 = vmatpush.msra.mxu2 %v174_v4  ;;  %v168_v7 = vld [vmem:[#allocation4 + $0x30] sm:$0xff]  ;;  %178 = vrot.lane.b32.xlu0 %v528_v1, %s546_s2  ;;  %v167_v9 = vld [vmem:[#allocation4 + $0x28] sm:$0xff]  ;;  %s604_s28 = sshll.u32 %s62_s27, 1  ;;  %s376_s6 = sshll.u32 %s540_s1, 1  ;;  %vm271_vm9 = vcmask 254976  }
   0xf   : > { %217 = vmatpush.msra.mxu3 %v169_v5  ;;  %v171_v10 = vld [vmem:[#allocation6 + $0x20] sm:$0xff]  ;;  %s64_s5 = scalar_lea.vmem %s690_s0, %s604_s28  ;;  %v73_v13 = vld [vmem:[#allocation6 + $0x18] sm:$0xff]  ;;  %v72_v15 = vld [vmem:[#allocation6 + $0x10] sm:$0xff]  ;;  %s60_s9 = scalar_lea.vmem %s690_s0, %s376_s6 }
  0x10   : > { %195 = vmatpush.msra.mxu2 %v173_v6  ;;  %v166_v11 = vld [vmem:[#allocation4 + $0x20] sm:$0xff]  ;;  %v69_v14 = vld [vmem:[#allocation4 + $0x18] sm:$0xff]  ;;  %93 = vmatpush.msra.mxu0 %v73_v13  ;;  %v68_v16 = vld [vmem:[#allocation4 + $0x10] sm:$0xff]  ;;  %s547_s14 = smov 64   ;;  %s270_s15 = scalar_lea.vmem [#allocation2], %s376_s6 }
  0x11   : > { %218 = vmatpush.msra.mxu3 %v168_v7  ;;  %v65_v12 = vld [vmem:[%s64_s5] sm:$0x3]  ;;  %116 = vmatpush.msra.mxu1 %v69_v14  ;;  %v71_v17 = vld [vmem:[#allocation6 + $0x8] sm:$0xff]  ;;  %s277_s16 = scalar_lea.vmem [#allocation3], %s604_s28  ;;  %s54_s1 = sadd.s32 1, %s540_s1  }
  0x12   : > { %196 = vmatpush.msra.mxu2 %v172_v8  ;;  %v67_v18 = vld [vmem:[#allocation4 + $0x8] sm:$0xff]  ;;  %94 = vmatpush.msra.mxu0 %v72_v15  ;;  %v70_v19 = vld [vmem:[#allocation6] sm:$0xff]  ;;  %p51_p0 = scmp.ge.s32.totalorder %s54_s1, 8  }
  0x13   : > { %219 = vmatpush.msra.mxu3 %v167_v9  ;;  %117 = vmatpush.msra.mxu1 %v68_v16  ;;  %v66_v20 = vld [vmem:[#allocation4] sm:$0xff]  ;;  %s548_s17 = smov (%p51_p0), 32   ;;  %vm336_vm10 = vcmask (%p51_p0), 517120  }
  0x14   : > { %197 = vmatpush.msra.mxu2 %v171_v10  ;;  %95 = vmatpush.msra.mxu0 %v71_v17  ;;  %v61_v21 = vld [vmem:[%s60_s9] sm:$0x3] }
  0x15   : > { %220 = vmatpush.msra.mxu3 %v166_v11  ;;  %118 = vmatpush.msra.mxu1 %v67_v18  ;;  %v433_v25 = vld [vmem:[%s693_s3] ss:$0 sm:$0xff]  ;;  %v432_v32 = vld [vmem:[%s693_s3 + $0x1] ss:$0 sm:$0xff] }
  0x16   : > { %76 = vrot.lane.b32.xlu0 %v536_v3, %s546_s2  ;;  %383 = vmatmul.msk.f32.vlgmr.msra.gmra.mxu3 %vm78_vm0, %v65_v12 }
  0x17   : > { %96 = vmatpush.msra.mxu0 %v70_v19  ;;  %119 = vmatpush.msra.mxu1 %v66_v20 }
  0x18   : > { %379 = vmatmul.msk.f32.vlgmr.msra.gmra.mxu1 %vm78_vm0, %v61_v21 }
  0x80   : > { %v179_v22 = vpop.permute.xlu0 %178 }
  0x81   : > { %382 = vmatmul.msk.f32.vlgmr.msra.gmra.mxu2 %vm78_vm0, %v179_v22 }
  0x88   : > { %v77_v23 = vpop.permute.xlu0 %76 }
  0x89   : > { %378 = vmatmul.msk.f32.vlgmr.msra.gmra.mxu0 %vm78_vm0, %v77_v23 }
  0x95   : > { %v121_v24 = vpop.f32.mrf.mxu1 }
  0x99   : > { %v222_v29 = vpop.f32.mrf.mxu3 }
 0x104   : > { %v199_v28 = vpop.f32.mrf.mxu2 }
 0x105   : > { %v223_v31 = vadd.f32 %v222_v29, %v199_v28 }
 0x106   : > { %v98_v26 = vpop.f32.mrf.mxu0 }
 0x107   : > { %v122_v27 = vadd.f32 %v121_v24, %v98_v26  ;;  %v228_v33 = vadd.f32 %v432_v32, %v223_v31 }
 0x109   : > { %v127_v30 = vadd.f32 %v433_v25, %v122_v27  ;;  %v384_v37 = vmul.f32 -1.442695, %v228_v33 }
 0x10b   : > { %434 = vtanh.f32 %v127_v30  ;;  %v380_v36 = vmul.f32 -1.442695, %v127_v30 }
 0x10c   : > { %436 = vtanh.f32 %v228_v33 }
 0x10d   : > { %438 = vpow2.f32 %v380_v36 }
 0x10e   : > { %440 = vpow2.f32 %v384_v37 }
 0x111   : > { %v435_v34 = vpop.eup %434 }
 0x112   : > { %150 = vrot.lane.b32.xlu1 %v435_v34, %s547_s14  ;;  %v437_v35 = vpop.eup %436 }
 0x113   : > { %v439_v38 = vpop.eup %438 }
 0x114   : > { %v131_v39 = vadd.f32 1.0, %v439_v38  ;;  %v441_v40 = vpop.eup %440 }
 0x115   : > { %v232_v41 = vadd.f32 1.0, %v441_v40 }
 0x116   : > { %442 = vrcp.f32 %v131_v39  ;;  %v143_v50 = vand.u32 2147483648, %v131_v39  ;;  %vm137_vm2 = vweird.f32 %v131_v39  ;;  %v141_v51 = vand.u32 2147483647, %v131_v39 }
 0x117   : > { %444 = vrcp.f32 %v232_v41  ;;  %v244_v59 = vand.u32 2147483648, %v232_v41  ;;  %vm238_vm6 = vweird.f32 %v232_v41  ;;  %v242_v60 = vand.u32 2147483647, %v232_v41 }
 0x118   : > { %v144_v54 = vor.u32 1.1754944e-38, %v143_v50  ;;  %vm142_vm4 = vcmp.eq.f32.partialorder %v141_v51, 8.507059e+37 }
 0x119   : > { %v245_v62 = vor.u32 1.1754944e-38, %v244_v59  ;;  %vm243_vm8 = vcmp.eq.f32.partialorder %v242_v60, 8.507059e+37 }
 0x11a   : > { %251 = vrot.lane.b32.xlu1 %v437_v35, %s547_s14 }
 0x11c   : > { %v443_v42 = vpop.eup %442 }
 0x11d   : > { %v133_v43 = vmul.f32 %v443_v42, %v131_v39  ;;  %v445_v45 = vpop.eup %444  ;;  %vm138_vm1 = vweird.f32 %v443_v42 }
 0x11e   : > { %v234_v47 = vmul.f32 %v445_v45, %v232_v41  ;;  %vm139_vm3 = vmor %vm137_vm2, %vm138_vm1  ;;  %vm239_vm5 = vweird.f32 %v445_v45 }
 0x11f   : > { %v134_v44 = vsub.f32 1.0, %v133_v43  ;;  %vm240_vm7 = vmor %vm238_vm6, %vm239_vm5 }
 0x120   : > { %v235_v49 = vsub.f32 1.0, %v234_v47 }
 0x121   : > { %v135_v46 = vmul.f32 %v443_v42, %v134_v44 }
 0x122   : > { %v236_v53 = vmul.f32 %v445_v45, %v235_v49 }
 0x123   : > { %v136_v48 = vadd.f32 %v443_v42, %v135_v46 }
 0x124   : > { %v237_v58 = vadd.f32 %v445_v45, %v236_v53 }
 0x125   : > { %v140_v52 = vsel %vm139_vm3, %v443_v42, %v136_v48 }
 0x126   : > { %v145_v56 = vsel %vm142_vm4, %v144_v54, %v140_v52  ;;  %v241_v61 = vsel %vm240_vm7, %v445_v45, %v237_v58 }
 0x127   : > { %v246_v63 = vsel %vm243_vm8, %v245_v62, %v241_v61  ;;  %v148_v4 = vmul.f32 %v532_v2, %v145_v56 }
 0x128   : > { %v249_v6 = vmul.f32 %v524_v0, %v246_v63 }
 0x184   : > { %v151_v55 = vpop.permute.xlu1 %150 }
 0x185   : > { %v153_v57 = vmul.f32 %v151_v55, %v145_v56 }
 0x187   : > { %155 = vrot.lane.b32.xlu2 %v153_v57, %s546_s2 }
 0x18c   : > { %v252_v1 = vpop.permute.xlu1 %251 }
 0x18d   : > { %v254_v3 = vmul.f32 %v252_v1, %v246_v63 }
 0x18f   : > { %256 = vrot.lane.b32.xlu2 %v254_v3, %s546_s2 }
 0x1e1   : > { %v156_v5 = vpop.permute.xlu2 %155 }
 0x1e2   : > { %v158_v2 = vadd.f32 %v156_v5, %v148_v4  }
 0x1e4   : > { %446 = vtanh.f32 %v158_v2 }
 0x1e9   : > { %v257_v7 = vpop.permute.xlu2 %256 }
 0x1ea   : > { %v447_v8 = vpop.eup %446  ;;  %v259_v0 = vadd.f32 %v257_v7, %v249_v6  }
 0x1eb   : > { %161 = vrot.lane.b32.xlu0 %v447_v8, %s547_s14 }
 0x1ec   : > { %448 = vtanh.f32 %v259_v0 }
 0x1f2   : > { %v449_v9 = vpop.eup %448 }
 0x1f3   : > { %262 = vrot.lane.b32.xlu1 %v449_v9, %s547_s14 }
 0x25d   : > { %v162_v10 = vpop.permute.xlu0 %161 }
 0x25e   : > { %v164_v3 = vmul.f32 %v162_v10, %v145_v56  }
 0x260   : > { %267 = vrot.lane.b32.xlu2 %v164_v3, %s546_s2 }
 0x265   : > { %v263_v11 = vpop.permute.xlu1 %262 }
 0x266   : > { %v265_v1 = vmul.f32 %v263_v11, %v246_v63  }
 0x268   : > { %274 = vrot.lane.b32.xlu0 %v265_v1, %s546_s2 }
 0x2ba   : > { %v268_v12 = vpop.permute.xlu2 %267 }
 0x2bb   : > { %272 = vst.msk [vmem:[%s270_s15] sm:$0x3] %vm271_vm9, %v268_v12 }
 0x2c2   :  { %v283_v22 = vld [vmem:[#allocation2 + $0x8] sm:$0x3] (%p51_p0)  ;;  %v284_v2 = vld [vmem:[#allocation2 + $0xa] sm:$0x3] (%p51_p0)  ;;  %v281_v26 = vld [vmem:[#allocation2 + $0x4] sm:$0x3] (%p51_p0) }
 0x2c3   :  { %v279_v27 = vld [vmem:[#allocation2] sm:$0x3] (%p51_p0)  ;;  %v282_v32 = vld [vmem:[#allocation2 + $0x6] sm:$0x3] (%p51_p0)  ;;  %v280_v33 = vld [vmem:[#allocation2 + $0x2] sm:$0x3] (%p51_p0) }
 0x2c4   :  { %v286_v38 = vld [vmem:[#allocation2 + $0xe] sm:$0x3] (%p51_p0)  ;;  %v285_v39 = vld [vmem:[#allocation2 + $0xc] sm:$0x3] (%p51_p0) }
 0x2d7   :  { %53 = sbr.rel (!%p51_p0) target bundleno = 13 (0xd), region = 58 }
 0x2da   : > { %v275_v13 = vpop.permute.xlu0 %274 }
 0x2db   : > { %278 = vst.msk [vmem:[%s277_s16] sm:$0x3] %vm271_vm9, %v275_v13 }
 0x2e2   :  { %v289_v14 = vld [vmem:[#allocation3 + $0x4] sm:$0x3]  ;;  %v287_v15 = vld [vmem:[#allocation3] sm:$0x3]  ;;  %v291_v16 = vld [vmem:[#allocation3 + $0x8] sm:$0x3] }
 0x2e3   :  { %307 = vrot.lane.b32.xlu1 %v289_v14, %s548_s17  ;;  %303 = vrot.lane.b32.xlu0 %v287_v15, %s548_s17  ;;  %v290_v17 = vld [vmem:[#allocation3 + $0x6] sm:$0x3]  ;;  %v288_v18 = vld [vmem:[#allocation3 + $0x2] sm:$0x3]  ;;  %v292_v19 = vld [vmem:[#allocation3 + $0xa] sm:$0x3] }
 0x2e4   :  { %311 = vrot.lane.b32.xlu2 %v291_v16, %s548_s17  ;;  %v294_v20 = vld [vmem:[#allocation3 + $0xe] sm:$0x3]  ;;  %v293_v21 = vld [vmem:[#allocation3 + $0xc] sm:$0x3] }
 0x2eb   :  { %309 = vrot.lane.b32.xlu1 %v290_v17, %s548_s17  ;;  %305 = vrot.lane.b32.xlu0 %v288_v18, %s548_s17 }
 0x2ec   :  { %313 = vrot.lane.b32.xlu2 %v292_v19, %s548_s17 }
 0x2f3   :  { %317 = vrot.lane.b32.xlu1 %v294_v20, %s548_s17  ;;  %315 = vrot.lane.b32.xlu0 %v293_v21, %s548_s17 }
 0x33e   :  { %v312_v23 = vpop.permute.xlu2 %311 }
 0x33f   :  { %v332_v0 = vsel %vm78_vm0, %v283_v22, %v312_v23 }
 0x340   :  { %341 = vst.msk [vmem:[%s694_s4 + $0x8] sm:$0x3] %vm336_vm10, %v332_v0 }
 0x346   :  { %v314_v24 = vpop.permute.xlu2 %313 }
 0x347   :  { %v333_v25 = vsel %vm78_vm0, %v284_v2, %v314_v24 }
 0x348   :  { %342 = vst.msk [vmem:[%s694_s4 + $0xa] sm:$0x3] %vm336_vm10, %v333_v25 }
 0x355   :  { %v308_v28 = vpop.permute.xlu1 %307  ;;  %v304_v29 = vpop.permute.xlu0 %303 }
 0x356   :  { %v330_v30 = vsel %vm78_vm0, %v281_v26, %v308_v28  ;;  %v328_v31 = vsel %vm78_vm0, %v279_v27, %v304_v29 }
 0x357   :  { %339 = vst.msk [vmem:[%s694_s4 + $0x4] sm:$0x3] %vm336_vm10, %v330_v30 }
 0x358   :  { %337 = vst.msk [vmem:[%s694_s4] sm:$0x3] %vm336_vm10, %v328_v31 }
 0x35d   :  { %v310_v34 = vpop.permute.xlu1 %309  ;;  %v306_v35 = vpop.permute.xlu0 %305 }
 0x35e   :  { %v331_v36 = vsel %vm78_vm0, %v282_v32, %v310_v34  ;;  %v329_v37 = vsel %vm78_vm0, %v280_v33, %v306_v35 }
 0x35f   :  { %340 = vst.msk [vmem:[%s694_s4 + $0x6] sm:$0x3] %vm336_vm10, %v331_v36 }
 0x360   :  { %338 = vst.msk [vmem:[%s694_s4 + $0x2] sm:$0x3] %vm336_vm10, %v329_v37 }
 0x365   :  { %v318_v40 = vpop.permute.xlu1 %317  ;;  %v316_v41 = vpop.permute.xlu0 %315 }
 0x366   :  { %v335_v42 = vsel %vm78_vm0, %v286_v38, %v318_v40  ;;  %v334_v43 = vsel %vm78_vm0, %v285_v39, %v316_v41 }
 0x367   :  { %344 = vst.msk [vmem:[%s694_s4 + $0xe] sm:$0x3] %vm336_vm10, %v335_v42 }
 0x368   :  { %343 = vst.msk [vmem:[%s694_s4 + $0xc] sm:$0x3] %vm336_vm10, %v334_v43 }
 0x369   :  { %349 = vsyncpa [#allocation5], 1 }
 0x36a   :  { %350 = vsyncpa [#allocation7], 1 }

// kernel: lstm_base_forward.3
= control target key start
LH: loop header
LB: loop body
LE: loop exit
PB: predicated region body
PF: predicated region fallthrough
CT: control target
= control target key end

     0   :  { %11 = vsyncpa [#allocation3], 0  ;;  %s775_s0 = inlined_call_operand.vmem [shape: f32[8,2,64], index: 0, kind: input, shape index: {}]   ;;  %s776_s1 = inlined_call_operand.vmem [shape: f32[2,64,128], index: 1, kind: input, shape index: {}]   ;;  %s777_s2 = inlined_call_operand.hbm [shape: f32[2,32,128], index: 2, kind: input, shape index: {}]   ;;  %s778_s3 = inlined_call_operand.vmem [shape: f32[2,1,128], index: 3, kind: input, shape index: {}]   ;;  %s779_s4 = inlined_call_operand.vmem [shape: f32[64,4], index: 4, kind: input, shape index: {}]   ;;  %s780_s5 = inlined_call_operand.vmem [shape: f32[1,4], index: 5, kind: input, shape index: {}]   ;;  %s781_s6 = inlined_call_operand.hbm [shape: f32[2,4], index: 6, kind: output, shape index: {}]  }
   0x1   :  { %12 = vsyncpa [#allocation4], 0  ;;  %s21_s23 = sshll.u32 %s777_s2, 4  ;;  %s573_s24 = smov [#allocation2]   ;;  %s22_s23 = int_to_ptr.hbm [resolvable:$true] %s21_s23 }
   0x2   :  { %s23_s25 = sshll.u32 %s573_s24, 4  ;;  %s574_s26 = smov 128   ;;  %s24_s25 = int_to_ptr.vmem [resolvable:$true] %s23_s25 }
   0x3   :  { %s575_s27 = smov 8  }
   0x4   :  { %29 = dma.hbm_to_vmem [thread:$0]  %s22_s23, 1024, %s24_s25, [#allocation3], %s574_s26, %s574_s26, %s575_s27  }
   0x5   :  { %541 = dma.done.wait [#allocation3], 1024  }
   0x6   :  { %542 = vsyncadd [#allocation3], 4294966272  ;;  %v619_v0 = vmov 0.0   ;;  %v621_v1 = vmov 0.0   ;;  %v623_v2 = vmov 0.0   ;;  %v625_v3 = vmov 0.0  }
   0x7   :  { %v627_v4 = vmov 0.0   ;;  %v629_v5 = vmov 0.0   ;;  %s631_s2 = smov 0  }
   0x8 LB: > { %v376_v6 = vld [vmem:[%s776_s1 + $0x78] sm:$0xff]  ;;  %v375_v7 = vld [vmem:[%s776_s1 + $0x70] sm:$0xff]  ;;  %s576_s10 = smov 32   ;;  %v374_v10 = vld [vmem:[%s776_s1 + $0x68] sm:$0xff]  ;;  %s55_s29 = ssub.s32 7, %s571_s2  ;;  %vm98_vm0 = vcmask 523264   ;;  %s571_s2 = sphi %s631_s2, %s45_s2   ;;  %v567_v5 = vphi %v629_v5, %v162_v5   ;;  %v563_v4 = vphi %v627_v4, %v156_v4   ;;  %v559_v3 = vphi %v625_v3, %v267_v3   ;;  %v555_v2 = vphi %v623_v2, %v261_v2   ;;  %v551_v1 = vphi %v621_v1, %v783_v1   ;;  %v547_v0 = vphi %v619_v0, %v782_v0  }
   0x9   : > { %215 = vmatpush.msra.mxu3 %v376_v6  ;;  %v66_v8 = vld [vmem:[%s776_s1 + $0x38] sm:$0xff]  ;;  %180 = vrot.lane.b32.xlu0 %v559_v3, %s576_s10  ;;  %v65_v11 = vld [vmem:[%s776_s1 + $0x30] sm:$0xff]  ;;  %v64_v13 = vld [vmem:[%s776_s1 + $0x28] sm:$0xff]  ;;  %s365_s30 = sshll.u32 %s55_s29, 1  ;;  %s364_s15 = sshll.u32 %s571_s2, 1  ;;  %vm75_vm1 = vcmask 261120  }
   0xa   : > { %v176_v9 = vld [vmem:[#allocation2 + $0x38] sm:$0xff]  ;;  %110 = vmatpush.msra.mxu1 %v66_v8  ;;  %v175_v12 = vld [vmem:[#allocation2 + $0x30] sm:$0xff]  ;;  %v373_v14 = vld [vmem:[%s776_s1 + $0x60] sm:$0xff]  ;;  %s57_s9 = scalar_lea.vmem %s775_s0, %s365_s30  ;;  %s53_s22 = scalar_lea.vmem %s775_s0, %s364_s15 }
   0xb   : > { %216 = vmatpush.msra.mxu3 %v375_v7  ;;  %196 = vmatpush.msra.mxu2 %v176_v9  ;;  %v174_v15 = vld [vmem:[#allocation2 + $0x28] sm:$0xff]  ;;  %v63_v16 = vld [vmem:[%s776_s1 + $0x20] sm:$0xff]  ;;  %v372_v17 = vld [vmem:[%s776_s1 + $0x58] sm:$0xff]  ;;  %s577_s27 = smov 64   ;;  %s45_s2 = sadd.s32 1, %s571_s2  }
   0xc   : > { %111 = vmatpush.msra.mxu1 %v65_v11  ;;  %v173_v18 = vld [vmem:[#allocation2 + $0x20] sm:$0xff]  ;;  %v371_v19 = vld [vmem:[%s776_s1 + $0x50] sm:$0xff]  ;;  %v370_v20 = vld [vmem:[%s776_s1 + $0x48] sm:$0xff]  ;;  %p42_p0 = scmp.ge.s32.totalorder %s45_s2, 8  }
   0xd   : > { %217 = vmatpush.msra.mxu3 %v374_v10  ;;  %197 = vmatpush.msra.mxu2 %v175_v12  ;;  %v369_v21 = vld [vmem:[%s776_s1 + $0x40] sm:$0xff]  ;;  %v70_v23 = vld [vmem:[#allocation2 + $0x18] sm:$0xff]  ;;  %v69_v25 = vld [vmem:[#allocation2 + $0x10] sm:$0xff]  ;;  %s578_s7 = smov (%p42_p0), 32   ;;  %s579_s11 = smov (%p42_p0), 64   ;;  %vm318_vm10 = vcmask (%p42_p0), 25600  }
   0xe   : > { %112 = vmatpush.msra.mxu1 %v64_v13  ;;  %v58_v22 = vld [vmem:[%s57_s9] sm:$0x3]  ;;  %v62_v24 = vld [vmem:[%s776_s1 + $0x18] sm:$0xff]  ;;  %90 = vmatpush.msra.mxu0 %v70_v23  ;;  %v61_v26 = vld [vmem:[%s776_s1 + $0x10] sm:$0xff]  ;;  %s580_s20 = smov (%p42_p0), [#allocation5]   ;;  %s327_s24 = sshll.u32 (%p42_p0), %s781_s6, 4  ;;  %s328_s24 = int_to_ptr.hbm [resolvable:$true] %s327_s24 }
   0xf   : > { %218 = vmatpush.msra.mxu3 %v373_v14  ;;  %198 = vmatpush.msra.mxu2 %v174_v15  ;;  %v68_v27 = vld [vmem:[#allocation2 + $0x8] sm:$0xff]  ;;  %v67_v29 = vld [vmem:[#allocation2] sm:$0xff]  ;;  %s325_s21 = sshll.u32 (%p42_p0), %s580_s20, 4  ;;  %s326_s21 = int_to_ptr.vmem [resolvable:$true] %s325_s21 }
  0x10   : > { %113 = vmatpush.msra.mxu1 %v63_v16  ;;  %v60_v28 = vld [vmem:[%s776_s1 + $0x8] sm:$0xff]  ;;  %91 = vmatpush.msra.mxu0 %v69_v25  ;;  %v59_v30 = vld [vmem:[%s776_s1] sm:$0xff] }
  0x11   : > { %219 = vmatpush.msra.mxu3 %v372_v17  ;;  %199 = vmatpush.msra.mxu2 %v173_v18  ;;  %v54_v31 = vld [vmem:[%s53_s22] sm:$0x3] }
  0x12   : > { %73 = vrot.lane.b32.xlu0 %v567_v5, %s576_s10  ;;  %114 = vmatpush.msra.mxu1 %v62_v24  ;;  %v447_v35 = vld [vmem:[%s778_s3] ss:$0 sm:$0xff]  ;;  %v446_v42 = vld [vmem:[%s778_s3 + $0x1] ss:$0 sm:$0xff] }
  0x13   : > { %220 = vmatpush.msra.mxu3 %v371_v19  ;;  %92 = vmatpush.msra.mxu0 %v68_v27 }
  0x14   : > { %115 = vmatpush.msra.mxu1 %v61_v26 }
  0x15   : > { %221 = vmatpush.msra.mxu3 %v370_v20  ;;  %93 = vmatpush.msra.mxu0 %v67_v29  ;;  %v288_v29 = vld [vmem:[%s779_s4 + $0x30] sm:$0xff] (%p42_p0) }
  0x16   : > { %116 = vmatpush.msra.mxu1 %v60_v28  ;;  %v289_v28 = vld [vmem:[%s779_s4 + $0x38] sm:$0xff] (%p42_p0) }
  0x17   : > { %222 = vmatpush.msra.mxu3 %v369_v21 }
  0x18   : > { %379 = vmatmul.msk.f32.vlgmr.msra.gmra.mxu3 %vm98_vm0, %v58_v22  ;;  %117 = vmatpush.msra.mxu1 %v59_v30  ;;  %v287_v30 = vld [vmem:[%s779_s4 + $0x28] sm:$0xff] (%p42_p0) }
  0x19   : > { %367 = vmatmul.msk.f32.vlgmr.msra.gmra.mxu1 %vm98_vm0, %v54_v31  ;;  %v282_v31 = vld [vmem:[%s779_s4] sm:$0xff] (%p42_p0) }
  0x7b   : > { %v181_v32 = vpop.permute.xlu0 %180 }
  0x7c   : > { %378 = vmatmul.msk.f32.vlgmr.msra.gmra.mxu2 %vm75_vm1, %v181_v32 }
  0x84   : > { %v74_v33 = vpop.permute.xlu0 %73 }
  0x85   : > { %366 = vmatmul.msk.f32.vlgmr.msra.gmra.mxu0 %vm75_vm1, %v74_v33 }
  0x86   :  { %306 = vmatpush.msra.mxu0 (%p42_p0), %v289_v28 }
  0x88   :  { %307 = vmatpush.msra.mxu0 (%p42_p0), %v288_v29 }
  0x8a   :  { %308 = vmatpush.msra.mxu0 (%p42_p0), %v287_v30 }
  0x96   : > { %v119_v34 = vpop.f32.mrf.mxu1 }
  0x9b   : > { %v224_v39 = vpop.f32.mrf.mxu3 }
  0xff   : > { %v201_v38 = vpop.f32.mrf.mxu2 }
 0x100   : > { %v225_v41 = vadd.f32 %v224_v39, %v201_v38 }
 0x102   : > { %v95_v36 = vpop.f32.mrf.mxu0  ;;  %v230_v43 = vadd.f32 %v446_v42, %v225_v41 }
 0x103   : > { %v120_v37 = vadd.f32 %v119_v34, %v95_v36 }
 0x104   : > { %v380_v47 = vmul.f32 -1.442695, %v230_v43 }
 0x105   : > { %v125_v40 = vadd.f32 %v447_v35, %v120_v37  ;;  %v464_v35 = vld [vmem:[%s780_s5] ss:$0 sm:$0xff] (%p42_p0) }
 0x107   : > { %448 = vtanh.f32 %v125_v40  ;;  %v368_v46 = vmul.f32 -1.442695, %v125_v40 }
 0x108   : > { %450 = vtanh.f32 %v230_v43 }
 0x109   : > { %452 = vpow2.f32 %v368_v46 }
 0x10a   : > { %454 = vpow2.f32 %v380_v47 }
 0x10d   : > { %v449_v44 = vpop.eup %448 }
 0x10e   : > { %148 = vrot.lane.b32.xlu1 %v449_v44, %s577_s27  ;;  %v451_v45 = vpop.eup %450 }
 0x10f   : > { %v453_v48 = vpop.eup %452 }
 0x110   : > { %v129_v49 = vadd.f32 1.0, %v453_v48  ;;  %v455_v50 = vpop.eup %454 }
 0x111   : > { %v234_v51 = vadd.f32 1.0, %v455_v50 }
 0x112   : > { %456 = vrcp.f32 %v129_v49  ;;  %v141_v60 = vand.u32 2147483648, %v129_v49  ;;  %vm135_vm3 = vweird.f32 %v129_v49  ;;  %v139_v61 = vand.u32 2147483647, %v129_v49 }
 0x113   : > { %458 = vrcp.f32 %v234_v51  ;;  %v246_v9 = vand.u32 2147483648, %v234_v51  ;;  %vm240_vm7 = vweird.f32 %v234_v51  ;;  %v244_v10 = vand.u32 2147483647, %v234_v51 }
 0x114   : > { %v142_v3 = vor.u32 1.1754944e-38, %v141_v60  ;;  %vm140_vm5 = vcmp.eq.f32.partialorder %v139_v61, 8.507059e+37 }
 0x115   : > { %v247_v12 = vor.u32 1.1754944e-38, %v246_v9  ;;  %vm245_vm9 = vcmp.eq.f32.partialorder %v244_v10, 8.507059e+37 }
 0x116   : > { %253 = vrot.lane.b32.xlu1 %v451_v45, %s577_s27 }
 0x118   : > { %v457_v52 = vpop.eup %456 }
 0x119   : > { %v131_v53 = vmul.f32 %v457_v52, %v129_v49  ;;  %v459_v55 = vpop.eup %458  ;;  %vm136_vm2 = vweird.f32 %v457_v52 }
 0x11a   : > { %v236_v57 = vmul.f32 %v459_v55, %v234_v51  ;;  %vm137_vm4 = vmor %vm135_vm3, %vm136_vm2  ;;  %vm241_vm6 = vweird.f32 %v459_v55 }
 0x11b   : > { %v132_v54 = vsub.f32 1.0, %v131_v53  ;;  %vm242_vm8 = vmor %vm240_vm7, %vm241_vm6 }
 0x11c   : > { %v237_v59 = vsub.f32 1.0, %v236_v57 }
 0x11d   : > { %v133_v56 = vmul.f32 %v457_v52, %v132_v54 }
 0x11e   : > { %v238_v63 = vmul.f32 %v459_v55, %v237_v59 }
 0x11f   : > { %v134_v58 = vadd.f32 %v457_v52, %v133_v56 }
 0x120   : > { %v239_v8 = vadd.f32 %v459_v55, %v238_v63 }
 0x121   : > { %v138_v62 = vsel %vm137_vm4, %v457_v52, %v134_v58 }
 0x122   : > { %v143_v6 = vsel %vm140_vm5, %v142_v3, %v138_v62  ;;  %v243_v11 = vsel %vm242_vm8, %v459_v55, %v239_v8 }
 0x123   : > { %v248_v13 = vsel %vm245_vm9, %v247_v12, %v243_v11  ;;  %v146_v16 = vmul.f32 %v563_v4, %v143_v6 }
 0x124   : > { %v251_v18 = vmul.f32 %v555_v2, %v248_v13 }
 0x180   : > { %v149_v5 = vpop.permute.xlu1 %148 }
 0x181   : > { %v151_v7 = vmul.f32 %v149_v5, %v143_v6 }
 0x183   : > { %153 = vrot.lane.b32.xlu2 %v151_v7, %s576_s10 }
 0x188   : > { %v254_v14 = vpop.permute.xlu1 %253 }
 0x189   : > { %v256_v15 = vmul.f32 %v254_v14, %v248_v13 }
 0x18b   : > { %258 = vrot.lane.b32.xlu2 %v256_v15, %s576_s10 }
 0x1dd   : > { %v154_v17 = vpop.permute.xlu2 %153 }
 0x1de   : > { %v156_v4 = vadd.f32 %v154_v17, %v146_v16  }
 0x1e0   : > { %460 = vtanh.f32 %v156_v4  ;;  %v283_v4 = vld [vmem:[%s779_s4 + $0x8] sm:$0xff] (%p42_p0) }
 0x1e5   : > { %v259_v19 = vpop.permute.xlu2 %258 }
 0x1e6   : > { %v461_v20 = vpop.eup %460  ;;  %v261_v2 = vadd.f32 %v259_v19, %v251_v18  }
 0x1e7   : > { %159 = vrot.lane.b32.xlu0 %v461_v20, %s577_s27 }
 0x1e8   : > { %462 = vtanh.f32 %v261_v2  ;;  %v284_v2 = vld [vmem:[%s779_s4 + $0x10] sm:$0xff] (%p42_p0) }
 0x1ee   : > { %v463_v21 = vpop.eup %462 }
 0x1ef   : > { %264 = vrot.lane.b32.xlu1 %v463_v21, %s577_s27 }
 0x259   : > { %v160_v22 = vpop.permute.xlu0 %159 }
 0x25a   : > { %v162_v5 = vmul.f32 %v160_v22, %v143_v6  }
 0x25c   : > { %v268_v23 = vmax.f32 %v162_v5, 0.0 }
 0x25e   : > { %v269_v24 = vmax.f32 %v551_v1, %v268_v23  }
 0x260   : > { %v783_v1 = vmov %v269_v24  ;;  %273 = vrot.lane.b32.xlu0 (%p42_p0), %v269_v24, %s578_s7 }
 0x261   : > { %v265_v25 = vpop.permute.xlu1 %264  ;;  %v285_v1 = vld [vmem:[%s779_s4 + $0x18] sm:$0xff] (%p42_p0) }
 0x262   : > { %v267_v3 = vmul.f32 %v265_v25, %v248_v13  }
 0x264   : > { %v270_v26 = vmax.f32 %v267_v3, 0.0  ;;  %44 = sbr.rel (!%p42_p0) target bundleno = 8 (0x8), region = 60 }
 0x266   : > { %v271_v27 = vmax.f32 %v547_v0, %v270_v26  }
 0x268   : > { %v782_v0 = vmov %v271_v27  ;;  %277 = vrot.lane.b32.xlu0 (%p42_p0), %v271_v27, %s579_s11 }
 0x269   :  { %v286_v0 = vld [vmem:[%s779_s4 + $0x20] sm:$0xff] }
 0x26a   :  { %309 = vmatpush.msra.mxu0 %v286_v0 }
 0x26c   :  { %310 = vmatpush.msra.mxu0 %v285_v1 }
 0x26e   :  { %311 = vmatpush.msra.mxu0 %v284_v2 }
 0x270   :  { %312 = vmatpush.msra.mxu0 %v283_v4 }
 0x272   :  { %313 = vmatpush.msra.mxu0 %v282_v31 }
 0x2d2   :  { %v274_v32 = vpop.permute.xlu0 %273 }
 0x2da   :  { %v278_v33 = vpop.permute.xlu0 %277 }
 0x2db   :  { %v281_v34 = vsel %vm75_vm1, %v274_v32, %v278_v33 }
 0x2dc   :  { %381 = vmatmul.msk.f32.vlgmr.msra.gmra.mxu0 %vm98_vm0, %v281_v34 }
 0x359   :  { %v315_v36 = vpop.f32.mrf.mxu0 }
 0x35a   :  { %v316_v37 = vadd.f32 %v464_v35, %v315_v36 }
 0x35c   :  { %319 = vst.msk [vmem:[#allocation5] sm:$0x3] %vm318_vm10, %v316_v37 }
 0x35d   :  { %330 = dma.vmem_to_hbm [thread:$0]  %s326_s21, 32, %s328_s24, [#allocation4]  }
 0x35e   :  { %543 = dma.done.wait [#allocation4], 32  }
 0x35f   :  { %544 = vsyncadd [#allocation4], 4294967264 }
 0x360   :  { %335 = vsyncpa [#allocation3], 1 }
 0x361   :  { %336 = vsyncpa [#allocation4], 1 }

</bundles_post_ra>
